<compile_context>
chip_gen: v7x
topology: tpu7x:2x2x1
jax: 0.10.0
libtpu: 0.0.40
codegen_flags: <defaults>
</compile_context>

<pallas_src>
import jax
import jax.numpy as jnp
from jax.experimental import pallas as pl
from jax.experimental.pallas import tpu as pltpu

LANE = 128


def _round_up(x, m):
    return (x + m - 1) // m * m


def _vmem_capacity_bytes():
    try:
        info = pltpu.get_tpu_info()
        for name in ("vmem_capacity_bytes", "vmem_bytes"):
            cap = getattr(info, name, None)
            if cap:
                return int(cap)
    except Exception:
        pass
    return 128 * 1024 * 1024  # v5e/v6e physical VMEM; conservative default.


def _sublane_pack(itemsize):
    # Rows per sublane tile: 8 for f32, 16 for bf16, 32 for int8/fp8.
    return max(8, 32 // max(1, itemsize))


def _pick_edge_tiles(n, hp, in_isize, out_isize, vx_isize):
    """Return (TI, TJ, vmem_limit_bytes) for the (1, TI, TJ, Hp) edge blocks."""
    cap = _vmem_capacity_bytes()
    # Total live-buffer budget: ~3/8 of physical VMEM, capped at 32 MiB.
    # v5e/v6e (128 MiB phys) -> 32 MiB; v7x (64 MiB per TC) -> 24 MiB.
    budget = min(32 << 20, max(8 << 20, (cap * 3) // 8))
    pack = _sublane_pack(in_isize)
    # TJ: full N when small, else 128 (a multiple of every sublane packing) so
    # the in-kernel (1,TI,TJ,Hp)->(TI*TJ,Hp) reshape stays layout-preserving.
    tj = n if n <= LANE else LANE
    # Bytes per unit of TI: double-buffered e tile + double-buffered out tile
    # + f32 epilogue intermediates (Ue and the broadcast sum), single-buffered.
    per_ti = tj * hp * (2 * in_isize + 2 * out_isize + 2 * 4)
    fixed = 2 * (n + 2 * LANE) * hp * vx_isize       # resident Vx (double-buffered)
    fixed += 2 * (hp * hp + hp) * in_isize           # resident Wu / bu
    fixed += 1 << 20                                 # Mosaic internal scratch slack
    ti = max(1, (budget - fixed) // per_ti)
    if ti < n:
        ti = max(pack, (ti // pack) * pack)
    ti = min(ti, n)
    est = fixed + per_ti * ti
    vmem_limit = int(min(max(est * 14 // 10, 32 << 20), cap * 3 // 4))
    return ti, tj, vmem_limit


def _node_kernel(x_ref, mask_ref, wv_ref, bv_ref, vx_ref):
    # x_ref: (TN, Hp), mask_ref: (TN, 1), wv: (Hp, Hp), bv: (1, Hp)
    vx = jnp.dot(x_ref[...], wv_ref[...], preferred_element_type=jnp.float32)
    vx = (vx + bv_ref[...].astype(jnp.float32)) * mask_ref[...]
    vx_ref[...] = vx.astype(vx_ref.dtype)


def _edge_kernel(e_ref, vx_ref, wu_ref, bu_ref, out_ref):
    # e_ref: (1, TI, TJ, Hp); vx_ref: (1, N_pad, Hp) VMEM-resident per batch.
    _, ti, tj, hp = e_ref.shape
    i = pl.program_id(0)   # row-tile axis (leads the grid -> megacore shard)
    j = pl.program_id(2)   # col-tile axis (innermost -> streams e)
    # Flatten (TI, TJ) into the MXU row dim; TJ is a multiple of the sublane
    # packing (or == N), so the reshape is layout-preserving.
    ue = jnp.dot(e_ref[...].reshape(ti * tj, hp), wu_ref[...],
                 preferred_element_type=jnp.float32)
    ue = (ue + bu_ref[...].astype(jnp.float32)).reshape(ti, tj, hp)
    row0 = pl.multiple_of(i * ti, ti)
    col0 = pl.multiple_of(j * tj, tj)
    vxi = vx_ref[0, pl.ds(row0, ti), :].astype(jnp.float32)
    vxj = vx_ref[0, pl.ds(col0, tj), :].astype(jnp.float32)
    out = ue + vxi[:, None, :] + vxj[None, :, :]
    out_ref[...] = out[None].astype(out_ref.dtype)


def edge_features_forward(x, e, mask, wu, bu, wv, bv, *,
                          compute_dtype=None, out_dtype=None,
                          alias_e_output=False):
    """EdgeFeatures forward.

    x:    (B, N, H)      node features
    e:    (B, N, N, H)   edge features
    mask: (B, N)         node mask (multiplies V(x))
    wu, wv: (H, H)       U.weight.T / V.weight.T   (stored as (in, out))
    bu, bv: (1, H) / (H,) biases
    compute_dtype: optional matmul-operand dtype.  None -> use the input dtype
        (pass bf16 x/e directly to halve the dominant e-read bytes, no extra pass).
    out_dtype: dtype of the returned edge tensor (None -> e.dtype); bf16 halves
        the output-write bytes.  Epilogue (bias + Vx adds) always stays f32.
    alias_e_output: donate e's buffer to the output (same dtype only).
    """
    B, N, H = x.shape
    assert e.shape == (B, N, N, H) and mask.shape == (B, N)
    out_dtype = e.dtype if out_dtype is None else jnp.dtype(out_dtype)
    bu = bu.reshape(1, -1)
    bv = bv.reshape(1, -1)

    if compute_dtype is not None:
        cd = jnp.dtype(compute_dtype)
        x, e = x.astype(cd), e.astype(cd)
    wu = wu.astype(e.dtype)          # weights match the matmul operand dtype
    wv = wv.astype(x.dtype)

    # --- lane-dense feature dim: zero-pad H up to a multiple of 128 ---------
    hp = _round_up(H, LANE)
    if hp != H:
        ph = hp - H
        x = jnp.pad(x, [(0, 0), (0, 0), (0, ph)])
        e = jnp.pad(e, [(0, 0), (0, 0), (0, 0), (0, ph)])
        wu = jnp.pad(wu, [(0, ph), (0, ph)])
        wv = jnp.pad(wv, [(0, ph), (0, ph)])
        bu = jnp.pad(bu, [(0, 0), (0, ph)])
        bv = jnp.pad(bv, [(0, 0), (0, ph)])

    in_isize = jnp.dtype(e.dtype).itemsize
    out_isize = jnp.dtype(out_dtype).itemsize
    vx_dtype = x.dtype if jnp.dtype(x.dtype).itemsize == 2 else jnp.float32
    vx_isize = jnp.dtype(vx_dtype).itemsize
    ti, tj, vmem_limit = _pick_edge_tiles(N, hp, in_isize, out_isize, vx_isize)

    # --- 1) Vx = mask * (x @ Wv + bv); B folded into the row axis -----------
    rows = B * N
    tn = rows if rows <= 512 else 512
    x2 = x.reshape(rows, hp)
    mask2 = mask.reshape(rows, 1).astype(jnp.float32)
    vx = pl.pallas_call(
        _node_kernel,
        out_shape=jax.ShapeDtypeStruct((rows, hp), vx_dtype),
        grid=(pl.cdiv(rows, tn),),
        in_specs=[
            pl.BlockSpec((tn, hp), lambda r: (r, 0)),
            pl.BlockSpec((tn, 1), lambda r: (r, 0)),
            pl.BlockSpec((hp, hp), lambda r: (0, 0)),   # resident Wv
            pl.BlockSpec((1, hp), lambda r: (0, 0)),    # resident bv
        ],
        out_specs=pl.BlockSpec((tn, hp), lambda r: (r, 0)),
        compiler_params=pltpu.CompilerParams(
            dimension_semantics=("parallel",)),
    )(x2, mask2, wv, bv)

    # Pad Vx rows so the in-kernel pl.ds(i*ti, ti) / pl.ds(j*tj, tj) slices
    # never read out of bounds on the last (partial) tile.
    n_pad = max(pl.cdiv(N, ti) * ti, pl.cdiv(N, tj) * tj)
    vx = vx.reshape(B, N, hp)
    if n_pad != N:
        vx = jnp.pad(vx, [(0, 0), (0, n_pad - N), (0, 0)])

    # --- 2) e_new = (e @ Wu + bu) + Vx_i + Vx_j ------------------------------
    gi, gj = pl.cdiv(N, ti), pl.cdiv(N, tj)
    flops = 2 * B * N * N * hp * hp + 3 * B * N * N * hp
    bytes_accessed = (B * N * N * hp) * (in_isize + out_isize) \
        + B * n_pad * hp * vx_isize + (hp * hp + hp) * in_isize
    aliases = {0: 0} if (alias_e_output and e.dtype == out_dtype) else {}

    out = pl.pallas_call(
        _edge_kernel,
        out_shape=jax.ShapeDtypeStruct((B, N, N, hp), out_dtype),
        grid=(gi, B, gj),                           # big parallel axis first
        in_specs=[
            pl.BlockSpec((1, ti, tj, hp), lambda i, b, j: (b, i, j, 0)),
            pl.BlockSpec((1, n_pad, hp), lambda i, b, j: (b, 0, 0)),  # Vx resident
            pl.BlockSpec((hp, hp), lambda i, b, j: (0, 0)),           # resident Wu
            pl.BlockSpec((1, hp), lambda i, b, j: (0, 0)),            # resident bu
        ],
        out_specs=pl.BlockSpec((1, ti, tj, hp), lambda i, b, j: (b, i, j, 0)),
        compiler_params=pltpu.CompilerParams(
            dimension_semantics=("parallel", "parallel", "parallel"),
            vmem_limit_bytes=vmem_limit),
        cost_estimate=pl.CostEstimate(
            flops=flops, transcendentals=0, bytes_accessed=bytes_accessed),
        input_output_aliases=aliases,
    )(e, vx, wu, bu)

    if hp != H:
        out = out[..., :H]
    return out


if __name__ == "__main__":
    # Small shapes consistent with the module: (B, N, H) nodes, (B, N, N, H) edges.
    B, N, H = 2, 8, 32
    key = jax.random.PRNGKey(0)
    kx, ke, km, kwu, kbu, kwv, kbv = jax.random.split(key, 7)

    x = jax.random.normal(kx, (B, N, H), dtype=jnp.float32)
    e = jax.random.normal(ke, (B, N, N, H), dtype=jnp.float32)
    mask = (jax.random.uniform(km, (B, N)) > 0.25).astype(jnp.float32)
    # Parameters stored as (in, out) = W^T of the PyTorch Linear layers.
    wu = jax.random.normal(kwu, (H, H), dtype=jnp.float32) * 0.1
    bu = jax.random.normal(kbu, (1, H), dtype=jnp.float32) * 0.1
    wv = jax.random.normal(kwv, (H, H), dtype=jnp.float32) * 0.1
    bv = jax.random.normal(kbv, (1, H), dtype=jnp.float32) * 0.1

    # Pure-JAX reference of the PyTorch forward:
    #   Ue + Vx.unsqueeze(2) + Vx.unsqueeze(1)  ->  Ue[b,i,j] + Vx[b,i] + Vx[b,j]
    vx_ref = mask[..., None] * (x @ wv + bv)
    ref = (e @ wu + bu) + vx_ref[:, :, None, :] + vx_ref[:, None, :, :]

    # f32 path (exact module semantics).
    out = edge_features_forward(x, e, mask, wu, bu, wv, bv)
    jax.block_until_ready(out)
    assert out.shape == (B, N, N, H) and out.dtype == e.dtype
    assert jnp.allclose(out, ref, atol=1e-4, rtol=1e-4)

    # bf16 I/O fast path (the bandwidth-bound case the kernel is tuned for):
    # bf16 x/e in HBM, bf16 output write, f32 accumulation + epilogue.
    out_bf16 = edge_features_forward(
        x.astype(jnp.bfloat16), e.astype(jnp.bfloat16), mask,
        wu, bu, wv, bv, out_dtype=jnp.bfloat16)
    jax.block_until_ready(out_bf16)
    assert out_bf16.shape == (B, N, N, H) and out_bf16.dtype == jnp.bfloat16
    assert jnp.allclose(out_bf16.astype(jnp.float32), ref, atol=1e-1, rtol=1e-1)

    print("KERNEL_OK")
</pallas_src>

<mosaic_0001>
module attributes {stable_mosaic.version = 11 : i64} {
  func.func @_node_kernel(%arg0: i32, %arg1: memref<16x128xf32, #tpu.memory_space<vmem>>, %arg2: memref<16x1xf32, #tpu.memory_space<vmem>>, %arg3: memref<128x128xf32, #tpu.memory_space<vmem>>, %arg4: memref<1x128xf32, #tpu.memory_space<vmem>>, %arg5: memref<16x128xf32, #tpu.memory_space<vmem>>) attributes {dimension_semantics = [#tpu.dimension_semantics<parallel>], iteration_bounds = array<i64: 1>, scalar_prefetch = 0 : i64, scratch_operands = 0 : i64, tpu.core_type = #tpu.core_type<tc>, window_params = [{transform_indices = @transform_0, window_bounds = array<i64: 16, 128>}, {transform_indices = @transform_1, window_bounds = array<i64: 16, 1>}, {pipeline_mode = #tpu.pipeline_mode<synchronous>, transform_indices = @transform_2, window_bounds = array<i64: 128, 128>}, {pipeline_mode = #tpu.pipeline_mode<synchronous>, transform_indices = @transform_3, window_bounds = array<i64: 1, 128>}, {transform_indices = @transform_4, window_bounds = array<i64: 16, 128>}]} {
    %c0 = arith.constant 0 : index
    %c0_0 = arith.constant 0 : index
    %0 = vector.load %arg1[%c0, %c0_0] : memref<16x128xf32, #tpu.memory_space<vmem>>, vector<16x128xf32>
    %c0_1 = arith.constant 0 : index
    %c0_2 = arith.constant 0 : index
    %1 = vector.load %arg3[%c0_1, %c0_2] : memref<128x128xf32, #tpu.memory_space<vmem>>, vector<128x128xf32>
    %cst = arith.constant dense<0.000000e+00> : vector<16x128xf32>
    %2 = tpu.matmul %0, %1, %cst {dimension_numbers = #tpu.dot_dimension_numbers<[1], [0], [0], [1], [0, 0, 1, 1], [], []>} : vector<16x128xf32>, vector<128x128xf32>, vector<16x128xf32> -> vector<16x128xf32>
    %c0_3 = arith.constant 0 : index
    %c0_4 = arith.constant 0 : index
    %3 = vector.load %arg4[%c0_3, %c0_4] : memref<1x128xf32, #tpu.memory_space<vmem>>, vector<1x128xf32>
    %4 = vector.broadcast %3 : vector<1x128xf32> to vector<16x128xf32>
    %5 = arith.addf %2, %4 : vector<16x128xf32>
    %c0_5 = arith.constant 0 : index
    %c0_6 = arith.constant 0 : index
    %6 = vector.load %arg2[%c0_5, %c0_6] : memref<16x1xf32, #tpu.memory_space<vmem>>, vector<16x1xf32>
    %7 = vector.broadcast %6 : vector<16x1xf32> to vector<16x128xf32>
    %8 = arith.mulf %5, %7 : vector<16x128xf32>
    %c0_7 = arith.constant 0 : index
    %c0_8 = arith.constant 0 : index
    %9 = vector.load %arg5[%c0_7, %c0_8] : memref<16x128xf32, #tpu.memory_space<vmem>>, vector<16x128xf32>
    tpu.vector_store %arg5[%c0_7, %c0_8], %8 {strides = array<i32>} : memref<16x128xf32, #tpu.memory_space<vmem>>, vector<16x128xf32>,
    return
  }
  func.func @transform_0(%arg0: i32) -> (i32, i32) {
    %c0_i32 = arith.constant 0 : i32
    %c0_i32_0 = arith.constant 0 : i32
    return %arg0, %c0_i32 : i32, i32
  }
  func.func @transform_1(%arg0: i32) -> (i32, i32) {
    %c0_i32 = arith.constant 0 : i32
    %c0_i32_0 = arith.constant 0 : i32
    return %arg0, %c0_i32 : i32, i32
  }
  func.func @transform_2(%arg0: i32) -> (i32, i32) {
    %c0_i32 = arith.constant 0 : i32
    %c0_i32_0 = arith.constant 0 : i32
    %c0_i32_1 = arith.constant 0 : i32
    return %c0_i32, %c0_i32_0 : i32, i32
  }
  func.func @transform_3(%arg0: i32) -> (i32, i32) {
    %c0_i32 = arith.constant 0 : i32
    %c0_i32_0 = arith.constant 0 : i32
    %c0_i32_1 = arith.constant 0 : i32
    return %c0_i32, %c0_i32_0 : i32, i32
  }
  func.func @transform_4(%arg0: i32) -> (i32, i32) {
    %c0_i32 = arith.constant 0 : i32
    %c0_i32_0 = arith.constant 0 : i32
    return %arg0, %c0_i32 : i32, i32
  }
}

</mosaic_0001>

<bundles_post_ra>
// kernel: tpu_custom_call.1
= control target key start
LH: loop header
LB: loop body
LE: loop exit
PB: predicated region body
PF: predicated region fallthrough
CT: control target
= control target key end

     0   :  { %9 = vsyncpa [#allocation3], 0  ;;  %s380_s0 = inlined_call_operand.vmem [shape: f32[16,128], index: 0, kind: input, shape index: {}]   ;;  %s381_s1 = inlined_call_operand.vmem [shape: f32[16,1], index: 1, kind: input, shape index: {}]   ;;  %s382_s2 = inlined_call_operand.hbm [shape: f32[128,128], index: 2, kind: input, shape index: {}]   ;;  %s383_s3 = inlined_call_operand.vmem [shape: f32[1,128], index: 3, kind: input, shape index: {}]   ;;  %s384_s4 = inlined_call_operand.hbm [shape: f32[16,128], index: 4, kind: output, shape index: {}]  }
   0x1   :  { %10 = vsyncpa [#allocation4], 0  ;;  %s305_s15 = smov [#allocation2]   ;;  %s257_s19 = scalar_lea.hbm %s382_s2, 2048 }
   0x2   :  { %s20_s16 = sshll.u32 %s305_s15, 4  ;;  %p258_p0 = scmp.ne.s32.totalorder %s382_s2, %s257_s19  ;;  %s21_s16 = int_to_ptr.vmem [resolvable:$true] %s20_s16 }
   0x3   :  { %p261_p1 = scmp.lt.u32.totalorder %s257_s19, %s382_s2 }
   0x5   :  { %p263_p2 = pnand %p261_p1, %p258_p0 }
   0x7   :  { %266 = shalt.err (!%p263_p2)
}
   0x8   :  { %s267_s24 = scalar_lea.vmem %s21_s16, 2048  ;;  %p272_p4 = scmp.lt.s32.totalorder %s21_s16, %s21_s16 }
   0x9   :  { %p268_p3 = scmp.ne.s32.totalorder %s21_s16, %s267_s24  ;;  %p273_p5 = scmp.lt.s32.totalorder %s267_s24, %s267_s24 }
   0xb   :  { %p274_p6 = por %p273_p5, %p272_p4 }
   0xd   :  { %p275_p7 = pnand %p274_p6, %p268_p3 }
   0xf   :  { %278 = shalt.err (!%p275_p7)
}
  0x10   :  { %s306_s25 = smov 128   ;;  %s307_s26 = smov 8  }
  0x11   :  { %26 = dma.hbm_to_vmem [thread:$0]  %s382_s2, 2048, %s21_s16, [#allocation3], %s306_s25, %s306_s25, %s307_s26  }
  0x12   :  { %301 = dma.done.wait [#allocation3], 2048  }
  0x13   :  { %302 = vsyncadd [#allocation3], 4294965248  ;;  %v308_v0 = vmov 0   ;;  %v34_v1 = vld [vmem:[#allocation2] sm:$0xff]  ;;  %v35_v2 = vld [vmem:[#allocation2 + $0x8] sm:$0xff]  ;;  %s309_s11 = smov [#allocation5]  }
  0x14   :  { %256 = vset.pattern.permute.xlu0 %v308_v0  ;;  %v36_v3 = vld [vmem:[#allocation2 + $0x10] sm:$0xff]  ;;  %v219_v4 = vpack.c.bf16 %v35_v2, %v34_v1  ;;  %v37_v5 = vld [vmem:[#allocation2 + $0x18] sm:$0xff]  ;;  %v38_v7 = vld [vmem:[#allocation2 + $0x20] sm:$0xff]  ;;  %s153_s12 = sshll.u32 %s309_s11, 4  ;;  %s154_s12 = int_to_ptr.vmem [resolvable:$true] %s153_s12 }
  0x15   :  { %v223_v6 = vpack.c.bf16 %v37_v5, %v36_v3  ;;  %v39_v8 = vld [vmem:[#allocation2 + $0x28] sm:$0xff]  ;;  %v32_v10 = vld [vmem:[%s380_s0] sm:$0xff]  ;;  %v40_v11 = vld [vmem:[#allocation2 + $0x30] sm:$0xff]  ;;  %s279_s13 = scalar_lea.vmem %s154_s12, 256  ;;  %p284_p9 = scmp.lt.s32.totalorder %s154_s12, %s154_s12 }
  0x16   :  { %220 = vmatprep.subr.bf16.mxu0 %v219_v4  ;;  %v227_v9 = vpack.c.bf16 %v39_v8, %v38_v7  ;;  %v41_v12 = vld [vmem:[#allocation2 + $0x38] sm:$0xff]  ;;  %216 = vmatprep.mubr.f32.mxu0 %v32_v10  ;;  %v132_v13 = vld [vmem:[%s381_s1] sm:$0xff]  ;;  %v133_v14 = vld [vmem:[%s381_s1 + $0x8] sm:$0xff]  ;;  %p280_p8 = scmp.ne.s32.totalorder %s154_s12, %s279_s13  ;;  %p285_p10 = scmp.lt.s32.totalorder %s279_s13, %s279_s13 }
  0x17   :  { %222 = vmatpush3.bf16.msra.mxu0 %v219_v4  ;;  %136 = vperm.xlu0 %256, %v132_v13   ;;  %v231_v15 = vpack.c.bf16 %v41_v12, %v40_v11  ;;  %v42_v16 = vld [vmem:[#allocation2 + $0x40] sm:$0xff]  ;;  %v43_v17 = vld [vmem:[#allocation2 + $0x48] sm:$0xff]  ;;  %v44_v19 = vld [vmem:[#allocation2 + $0x50] sm:$0xff] }
  0x18   :  { %224 = vmatprep.subr.bf16.mxu0 %v223_v6  ;;  %v235_v18 = vpack.c.bf16 %v43_v17, %v42_v16  ;;  %v45_v20 = vld [vmem:[#allocation2 + $0x58] sm:$0xff]  ;;  %v46_v22 = vld [vmem:[#allocation2 + $0x60] sm:$0xff]  ;;  %v47_v23 = vld [vmem:[#allocation2 + $0x68] sm:$0xff]  ;;  %p286_p11 = por %p285_p10, %p284_p9 }
  0x19   :  { %v239_v21 = vpack.c.bf16 %v45_v20, %v44_v19  ;;  %v243_v24 = vpack.c.bf16 %v47_v23, %v46_v22  ;;  %v48_v25 = vld [vmem:[#allocation2 + $0x70] sm:$0xff]  ;;  %v49_v26 = vld [vmem:[#allocation2 + $0x78] sm:$0xff]  ;;  %v33_v28 = vld [vmem:[%s380_s0 + $0x8] sm:$0xff] }
  0x1a   :  { %v247_v27 = vpack.c.bf16 %v49_v26, %v48_v25  ;;  %v165_v30 = vld [vmem:[%s383_s3] ss:$0 sm:$0xff]  ;;  %p287_p12 = pnand %p286_p11, %p280_p8 }
  0x1b   :  { %226 = vmatpush3.bf16.msra.mxu0 %v223_v6  ;;  %141 = vperm.xlu0 %256, %v133_v14  }
  0x1c   :  { %228 = vmatprep.subr.bf16.mxu0 %v227_v9 }
  0x1f   :  { %230 = vmatpush3.bf16.msra.mxu0 %v227_v9 }
  0x20   :  { %232 = vmatprep.subr.bf16.mxu0 %v231_v15 }
  0x23   :  { %234 = vmatpush3.bf16.msra.mxu0 %v231_v15 }
  0x24   :  { %236 = vmatprep.subr.bf16.mxu0 %v235_v18 }
  0x27   :  { %238 = vmatpush3.bf16.msra.mxu0 %v235_v18 }
  0x28   :  { %240 = vmatprep.subr.bf16.mxu0 %v239_v21 }
  0x2b   :  { %242 = vmatpush3.bf16.msra.mxu0 %v239_v21 }
  0x2c   :  { %244 = vmatprep.subr.bf16.mxu0 %v243_v24 }
  0x2f   :  { %246 = vmatpush3.bf16.msra.mxu0 %v243_v24 }
  0x30   :  { %248 = vmatprep.subr.bf16.mxu0 %v247_v27 }
  0x33   :  { %250 = vmatpush3.bf16.msra.mxu0 %v247_v27 }
  0x36   :  { %217 = vmatmul.mubr.f32.vlgmr.msra.gmra.mrb[0].mxu0 %v33_v28 }
  0x96   :  { %v137_v29 = vpop.permute.xlu0 %136 }
  0x9a   :  { %v142_v34 = vpop.permute.xlu0 %141 }
 0x109   :  { %v218_v31 = vpop.f32.mrb[0].mxu0 }
 0x10a   :  { %v129_v32 = vadd.f32 %v218_v31, %v165_v30  ;;  %v123_v33 = vpop.f32.mrb[1].mxu0 }
 0x10b   :  { %v124_v35 = vadd.f32 %v165_v30, %v123_v33 }
 0x10c   :  { %v145_v36 = vmul.f32 %v142_v34, %v129_v32 }
 0x10d   :  { %v144_v37 = vmul.f32 %v137_v29, %v124_v35 }
 0x10e   :  { %147 = vst [vmem:[#allocation5 + $0x8] sm:$0xff] %v145_v36 }
 0x10f   :  { %146 = vst [vmem:[#allocation5] sm:$0xff] %v144_v37 }
 0x110   :  { %290 = shalt.err (!%p287_p12)
}
 0x111   :  { %s291_s14 = scalar_lea.hbm %s384_s4, 256 }
 0x112   :  { %p292_p13 = scmp.ne.s32.totalorder %s384_s4, %s291_s14  ;;  %p295_p0 = scmp.lt.u32.totalorder %s291_s14, %s384_s4 }
 0x114   :  { %p297_p1 = pnand %p295_p0, %p292_p13 }
 0x116   :  { %300 = shalt.err (!%p297_p1)
}
 0x117   :  { %159 = dma.vmem_to_hbm [thread:$0]  %s154_s12, 256, %s384_s4, [#allocation4], %s306_s25, %s306_s25, %s307_s26  }
 0x118   :  { %303 = dma.done.wait [#allocation4], 256  }
 0x119   :  { %304 = vsyncadd [#allocation4], 4294967040 }
 0x11a   :  { %163 = vsyncpa [#allocation3], 1 }
 0x11b   :  { %164 = vsyncpa [#allocation4], 1 }

</bundles_post_ra>
